<compile_context>
chip_gen: v7x
topology: tpu7x:2x2x1
jax: 0.10.0
libtpu: 0.0.40
codegen_flags: <defaults>
</compile_context>

<pallas_src>
import functools

import jax
import jax.numpy as jnp
from jax import lax
from jax.experimental import pallas as pl
from jax.experimental.pallas import tpu as pltpu

NUM_DOMAINS = 3   # adapters_count = 3 in the module


def _dsa_kernel(x_ref, wcat_ref, bcat_ref, sel_ref, w2b_ref, o_ref, *, dh, inv_hw):
    x = x_ref[...]                                             # (Bblk, C, HW), native dtype

    # Global average pool over the spatial lanes (f32 accumulation).
    pooled = jnp.sum(x.astype(jnp.float32), axis=-1) * jnp.float32(inv_hw)   # (Bblk, C)

    # One fused matmul: all 3 adapter fc1's plus the domain-logit fc.
    z = jnp.dot(pooled, wcat_ref[...],
                preferred_element_type=jnp.float32) + bcat_ref[...]          # (Bblk, dh+D)

    col = lax.broadcasted_iota(jnp.int32, z.shape, 1)
    is_hidden = col < dh                       # first dh lanes = adapter hiddens, rest = logits

    # Hidden activations (logit lanes zeroed) and a masked softmax over the
    # trailing D logit lanes -- everything full width, no lane-granular slices.
    h = jnp.where(is_hidden, jnp.maximum(z, 0.0), 0.0)
    logits = jnp.where(is_hidden, -jnp.inf, z)
    m = jnp.max(logits, axis=-1, keepdims=True)
    e = jnp.where(is_hidden, 0.0, jnp.exp(z - m))
    dw = e / jnp.sum(e, axis=-1, keepdims=True)                # dw in trailing D lanes, else 0

    # Broadcast each domain weight across its adapter's hidden lanes via a tiny
    # precomputed selector matmul, fold into the activations, keep dw trailing.
    lhs = h * jnp.dot(dw, sel_ref[...], preferred_element_type=jnp.float32) + dw

    # Single second matmul: w2b rows are [w2_0; w2_1; w2_2; b2], so this is
    # sum_d dw_d * (relu(h_d) @ w2_d + b2_d).
    att = jnp.dot(lhs, w2b_ref[...], preferred_element_type=jnp.float32)     # (Bblk, C)
    gate = jax.nn.sigmoid(att)

    # out = x * gate + x  ==  x * (gate + 1): one VPU op per x element.
    scale = (gate + 1.0).astype(x.dtype)
    o_ref[...] = x * scale[:, :, None]


def _pack_params(params):
    """Concatenate per-domain weights into the two fused matrices + selector."""
    w1, b1, w2, b2, fcw, fcb = params
    D, C, Hh = w1.shape
    dh = D * Hh
    dhD = dh + D
    f32 = jnp.float32
    wcat = jnp.concatenate([w1[d] for d in range(D)] + [fcw], axis=1).astype(f32)    # (C, dhD)
    bcat = jnp.concatenate([b1.reshape(-1), fcb.reshape(-1)])[None, :].astype(f32)   # (1, dhD)
    w2b = jnp.concatenate([w2.reshape(dh, C), b2], axis=0).astype(f32)               # (dhD, C)
    # Selector: row (dh + d) is 1 over columns [d*Hh, (d+1)*Hh) -> expands dw
    # to per-hidden-lane weights with one tiny matmul.
    row = jnp.arange(dhD)[:, None]
    col = jnp.arange(dhD)[None, :]
    sel = ((row >= dh) & (col < dh) & (col // Hh == (row - dh))).astype(f32)         # (dhD, dhD)
    return wcat, bcat, sel, w2b, Hh


def domain_specific_attention(x_nchw, params):
    """x_nchw: (B, C, H, W). Returns (B, C, H, W) in the same dtype."""
    B, C, H, W = x_nchw.shape
    HW = H * W
    # No pad, no dtype cast: block last dims equal the full (C, HW) extents.
    x = x_nchw.reshape(B, C, HW)

    wcat, bcat, sel, w2b, Hh = _pack_params(params)
    dh = NUM_DOMAINS * Hh
    dhD = dh + NUM_DOMAINS

    # --- batch-block sizing --------------------------------------------------
    # ~4 MiB tiles amortize the ~0.35us/grid-step overhead (and fit v7x's
    # 64 MiB physical VMEM when double-buffered in+out), but cap bblk so the
    # grid has >= ~4 steps: keeps DMA/compute pipelining alive and gives both
    # v7x TensorCores work even for small B.  Remainder blocks are fine (rows
    # are independent; OOB rows' outputs are discarded by Pallas).
    row_bytes = C * HW * x.dtype.itemsize
    target_bytes = 4 * 1024 * 1024
    bblk = max(1, target_bytes // max(row_bytes, 1))
    bblk = min(bblk, max(1, pl.cdiv(B, 4)))
    if bblk >= 8:
        bblk = (bblk // 8) * 8          # sublane-aligned pooled/gate tiles
    bblk = max(1, min(bblk, B))
    grid = pl.cdiv(B, bblk)

    tile_bytes = bblk * row_bytes
    vmem_limit = int(min(max(48 << 20, 4 * tile_bytes + (8 << 20)), 96 << 20))

    kernel = functools.partial(_dsa_kernel, dh=dh, inv_hw=1.0 / HW)

    out = pl.pallas_call(
        kernel,
        out_shape=jax.ShapeDtypeStruct((B, C, HW), x.dtype),
        grid_spec=pltpu.PrefetchScalarGridSpec(
            num_scalar_prefetch=0,
            grid=(grid,),
            in_specs=[
                pl.BlockSpec((bblk, C, HW), lambda b: (b, 0, 0)),   # x
                pl.BlockSpec((C, dhD), lambda b: (0, 0)),           # fused fc1 weights
                pl.BlockSpec((1, dhD), lambda b: (0, 0)),           # fused fc1 biases
                pl.BlockSpec((dhD, dhD), lambda b: (0, 0)),         # dw-expansion selector
                pl.BlockSpec((dhD, C), lambda b: (0, 0)),           # fused fc2 weights + b2
            ],
            out_specs=pl.BlockSpec((bblk, C, HW), lambda b: (b, 0, 0)),
        ),
        compiler_params=pltpu.CompilerParams(
            dimension_semantics=("parallel",),
            vmem_limit_bytes=vmem_limit),
    )(x, wcat, bcat, sel, w2b)

    return out.reshape(B, C, H, W)


def _reference(x_nchw, params):
    """Pure-JAX reference of the PyTorch forward."""
    w1, b1, w2, b2, fcw, fcb = params
    xf = x_nchw.astype(jnp.float32)
    pooled = jnp.mean(xf, axis=(2, 3))                            # (B, C)
    dw = jax.nn.softmax(pooled @ fcw + fcb[0], axis=1)            # (B, D)
    atts = []
    for d in range(NUM_DOMAINS):
        h = jax.nn.relu(pooled @ w1[d] + b1[d])
        atts.append(h @ w2[d] + b2[d])                            # (B, C)
    att_mat = jnp.stack(atts, axis=2)                             # (B, C, D)
    att = jnp.einsum("bcd,bd->bc", att_mat, dw)                   # (B, C)
    gate = jax.nn.sigmoid(att)[:, :, None, None]                  # (B, C, 1, 1)
    return (xf * gate + xf).astype(x_nchw.dtype)


def _init_params(key, channels, reduction_ratio):
    hidden = channels // reduction_ratio
    ks = jax.random.split(key, 6)
    w1 = 0.1 * jax.random.normal(ks[0], (NUM_DOMAINS, channels, hidden), jnp.float32)
    b1 = 0.1 * jax.random.normal(ks[1], (NUM_DOMAINS, hidden), jnp.float32)
    w2 = 0.1 * jax.random.normal(ks[2], (NUM_DOMAINS, hidden, channels), jnp.float32)
    b2 = 0.1 * jax.random.normal(ks[3], (NUM_DOMAINS, channels), jnp.float32)
    fcw = 0.1 * jax.random.normal(ks[4], (channels, NUM_DOMAINS), jnp.float32)
    fcb = 0.1 * jax.random.normal(ks[5], (1, NUM_DOMAINS), jnp.float32)
    return (w1, b1, w2, b2, fcw, fcb)


if __name__ == "__main__":
    B, C, H, W = 4, 64, 16, 16     # HW = 256; hidden = 8
    reduction_ratio = 8

    key = jax.random.PRNGKey(0)
    kx, kp = jax.random.split(key)
    x = jax.random.normal(kx, (B, C, H, W), jnp.float32)
    params = _init_params(kp, C, reduction_ratio)

    out = jax.block_until_ready(domain_specific_attention(x, params))

    ref = _reference(x, params)
    assert out.shape == (B, C, H, W)
    max_err = float(jnp.max(jnp.abs(out - ref)))
    assert jnp.allclose(out, ref, atol=1e-5, rtol=1e-5), max_err

    print("KERNEL_OK")
</pallas_src>

<mosaic_0001>
module attributes {stable_mosaic.version = 11 : i64} {
  func.func @_dsa_kernel(%arg0: i32, %arg1: memref<1x64x256xf32, #tpu.memory_space<vmem>>, %arg2: memref<64x27xf32, #tpu.memory_space<vmem>>, %arg3: memref<1x27xf32, #tpu.memory_space<vmem>>, %arg4: memref<27x27xf32, #tpu.memory_space<vmem>>, %arg5: memref<27x64xf32, #tpu.memory_space<vmem>>, %arg6: memref<1x64x256xf32, #tpu.memory_space<vmem>>) attributes {dimension_semantics = [#tpu.dimension_semantics<parallel>], iteration_bounds = array<i64: 4>, scalar_prefetch = 0 : i64, scratch_operands = 0 : i64, tpu.core_type = #tpu.core_type<tc>, window_params = [{transform_indices = @transform_0, window_bounds = array<i64: 1, 64, 256>}, {pipeline_mode = #tpu.pipeline_mode<synchronous>, transform_indices = @transform_1, window_bounds = array<i64: 64, 27>}, {pipeline_mode = #tpu.pipeline_mode<synchronous>, transform_indices = @transform_2, window_bounds = array<i64: 1, 27>}, {pipeline_mode = #tpu.pipeline_mode<synchronous>, transform_indices = @transform_3, window_bounds = array<i64: 27, 27>}, {pipeline_mode = #tpu.pipeline_mode<synchronous>, transform_indices = @transform_4, window_bounds = array<i64: 27, 64>}, {transform_indices = @transform_5, window_bounds = array<i64: 1, 64, 256>}]} {
    %c0 = arith.constant 0 : index
    %c0_0 = arith.constant 0 : index
    %c0_1 = arith.constant 0 : index
    %0 = vector.load %arg1[%c0, %c0_0, %c0_1] : memref<1x64x256xf32, #tpu.memory_space<vmem>>, vector<1x64x256xf32>
    %cst = arith.constant dense<0.000000e+00> : vector<1x64xf32>
    %1 = vector.multi_reduction <add>, %0, %cst [2] : vector<1x64x256xf32> to vector<1x64xf32>
    %cst_2 = arith.constant 3.906250e-03 : f32
    %2 = vector.broadcast %cst_2 : f32 to vector<1x64xf32>
    %3 = arith.mulf %1, %2 : vector<1x64xf32>
    %c0_3 = arith.constant 0 : index
    %c0_4 = arith.constant 0 : index
    %4 = vector.load %arg2[%c0_3, %c0_4] : memref<64x27xf32, #tpu.memory_space<vmem>>, vector<64x27xf32>
    %cst_5 = arith.constant dense<0.000000e+00> : vector<1x27xf32>
    %5 = tpu.matmul %3, %4, %cst_5 {dimension_numbers = #tpu.dot_dimension_numbers<[1], [0], [0], [1], [0, 0, 1, 1], [], []>} : vector<1x64xf32>, vector<64x27xf32>, vector<1x27xf32> -> vector<1x27xf32>
    %c0_6 = arith.constant 0 : index
    %c0_7 = arith.constant 0 : index
    %6 = vector.load %arg3[%c0_6, %c0_7] : memref<1x27xf32, #tpu.memory_space<vmem>>, vector<1x27xf32>
    %7 = arith.addf %5, %6 : vector<1x27xf32>
    %8 = tpu.iota {dimensions = array<i32: 1>} : vector<1x27xi32>
    %c24_i32 = arith.constant 24 : i32
    %9 = vector.broadcast %c24_i32 : i32 to vector<1x27xi32>
    %10 = arith.cmpi slt, %8, %9 : vector<1x27xi32>
    %cst_8 = arith.constant 0.000000e+00 : f32
    %11 = vector.broadcast %cst_8 : f32 to vector<1x27xf32>
    %12 = arith.maximumf %7, %11 : vector<1x27xf32>
    %cst_9 = arith.constant 0.000000e+00 : f32
    %13 = vector.broadcast %cst_9 : f32 to vector<1x27xf32>
    %14 = arith.select %10, %12, %13 : vector<1x27xi1>, vector<1x27xf32>
    %cst_10 = arith.constant 0xFF800000 : f32
    %15 = vector.broadcast %cst_10 : f32 to vector<1x27xf32>
    %16 = arith.select %10, %15, %7 : vector<1x27xi1>, vector<1x27xf32>
    %cst_11 = arith.constant dense<0xFF800000> : vector<1xf32>
    %17 = vector.multi_reduction <maximumf>, %16, %cst_11 [1] : vector<1x27xf32> to vector<1xf32>
    %18 = vector.shape_cast %17 : vector<1xf32> to vector<1x1xf32>
    %19 = vector.broadcast %18 : vector<1x1xf32> to vector<1x27xf32>
    %20 = arith.subf %7, %19 : vector<1x27xf32>
    %21 = math.exp %20 : vector<1x27xf32>
    %cst_12 = arith.constant 0.000000e+00 : f32
    %22 = vector.broadcast %cst_12 : f32 to vector<1x27xf32>
    %23 = arith.select %10, %22, %21 : vector<1x27xi1>, vector<1x27xf32>
    %cst_13 = arith.constant dense<0.000000e+00> : vector<1xf32>
    %24 = vector.multi_reduction <add>, %23, %cst_13 [1] : vector<1x27xf32> to vector<1xf32>
    %25 = vector.shape_cast %24 : vector<1xf32> to vector<1x1xf32>
    %26 = vector.broadcast %25 : vector<1x1xf32> to vector<1x27xf32>
    %27 = arith.divf %23, %26 : vector<1x27xf32>
    %c0_14 = arith.constant 0 : index
    %c0_15 = arith.constant 0 : index
    %28 = vector.load %arg4[%c0_14, %c0_15] : memref<27x27xf32, #tpu.memory_space<vmem>>, vector<27x27xf32>
    %cst_16 = arith.constant dense<0.000000e+00> : vector<1x27xf32>
    %29 = tpu.matmul %27, %28, %cst_16 {dimension_numbers = #tpu.dot_dimension_numbers<[1], [0], [0], [1], [0, 0, 1, 1], [], []>} : vector<1x27xf32>, vector<27x27xf32>, vector<1x27xf32> -> vector<1x27xf32>
    %30 = arith.mulf %14, %29 : vector<1x27xf32>
    %31 = arith.addf %30, %27 : vector<1x27xf32>
    %c0_17 = arith.constant 0 : index
    %c0_18 = arith.constant 0 : index
    %32 = vector.load %arg5[%c0_17, %c0_18] : memref<27x64xf32, #tpu.memory_space<vmem>>, vector<27x64xf32>
    %cst_19 = arith.constant dense<0.000000e+00> : vector<1x64xf32>
    %33 = tpu.matmul %31, %32, %cst_19 {dimension_numbers = #tpu.dot_dimension_numbers<[1], [0], [0], [1], [0, 0, 1, 1], [], []>} : vector<1x27xf32>, vector<27x64xf32>, vector<1x64xf32> -> vector<1x64xf32>
    %34 = arith.negf %33 : vector<1x64xf32>
    %35 = math.exp %34 : vector<1x64xf32>
    %cst_20 = arith.constant 1.000000e+00 : f32
    %36 = vector.broadcast %cst_20 : f32 to vector<1x64xf32>
    %37 = arith.addf %36, %35 : vector<1x64xf32>
    %38 = arith.divf %36, %37 : vector<1x64xf32>
    %cst_21 = arith.constant 1.000000e+00 : f32
    %39 = vector.broadcast %cst_21 : f32 to vector<1x64xf32>
    %40 = arith.addf %38, %39 : vector<1x64xf32>
    %41 = vector.shape_cast %40 : vector<1x64xf32> to vector<1x64x1xf32>
    %42 = vector.broadcast %41 : vector<1x64x1xf32> to vector<1x64x256xf32>
    %43 = arith.mulf %0, %42 : vector<1x64x256xf32>
    %c0_22 = arith.constant 0 : index
    %c0_23 = arith.constant 0 : index
    %c0_24 = arith.constant 0 : index
    %44 = vector.load %arg6[%c0_22, %c0_23, %c0_24] : memref<1x64x256xf32, #tpu.memory_space<vmem>>, vector<1x64x256xf32>
    tpu.vector_store %arg6[%c0_22, %c0_23, %c0_24], %43 {strides = array<i32>} : memref<1x64x256xf32, #tpu.memory_space<vmem>>, vector<1x64x256xf32>,
    return
  }
  func.func @transform_0(%arg0: i32) -> (i32, i32, i32) {
    %c0_i32 = arith.constant 0 : i32
    %c0_i32_0 = arith.constant 0 : i32
    %c0_i32_1 = arith.constant 0 : i32
    return %arg0, %c0_i32, %c0_i32_0 : i32, i32, i32
  }
  func.func @transform_1(%arg0: i32) -> (i32, i32) {
    %c0_i32 = arith.constant 0 : i32
    %c0_i32_0 = arith.constant 0 : i32
    %c0_i32_1 = arith.constant 0 : i32
    return %c0_i32, %c0_i32_0 : i32, i32
  }
  func.func @transform_2(%arg0: i32) -> (i32, i32) {
    %c0_i32 = arith.constant 0 : i32
    %c0_i32_0 = arith.constant 0 : i32
    %c0_i32_1 = arith.constant 0 : i32
    return %c0_i32, %c0_i32_0 : i32, i32
  }
  func.func @transform_3(%arg0: i32) -> (i32, i32) {
    %c0_i32 = arith.constant 0 : i32
    %c0_i32_0 = arith.constant 0 : i32
    %c0_i32_1 = arith.constant 0 : i32
    return %c0_i32, %c0_i32_0 : i32, i32
  }
  func.func @transform_4(%arg0: i32) -> (i32, i32) {
    %c0_i32 = arith.constant 0 : i32
    %c0_i32_0 = arith.constant 0 : i32
    %c0_i32_1 = arith.constant 0 : i32
    return %c0_i32, %c0_i32_0 : i32, i32
  }
  func.func @transform_5(%arg0: i32) -> (i32, i32, i32) {
    %c0_i32 = arith.constant 0 : i32
    %c0_i32_0 = arith.constant 0 : i32
    %c0_i32_1 = arith.constant 0 : i32
    return %arg0, %c0_i32, %c0_i32_0 : i32, i32, i32
  }
}

</mosaic_0001>

<bundles_post_ra>
// kernel: tpu_custom_call.1
= control target key start
LH: loop header
LB: loop body
LE: loop exit
PB: predicated region body
PF: predicated region fallthrough
CT: control target
= control target key end

     0   :  { %10 = vsyncpa [#allocation3], 0  ;;  %s1437_s0 = inlined_call_operand.hbm [shape: f32[4,64,256], index: 0, kind: input, shape index: {}]   ;;  %s1438_s1 = inlined_call_operand.vmem [shape: f32[64,27], index: 1, kind: input, shape index: {}]   ;;  %s1439_s2 = inlined_call_operand.vmem [shape: f32[1,27], index: 2, kind: input, shape index: {}]   ;;  %s1440_s3 = inlined_call_operand.vmem [shape: f32[27,27], index: 3, kind: input, shape index: {}]   ;;  %s1441_s4 = inlined_call_operand.vmem [shape: f32[27,64], index: 4, kind: input, shape index: {}]   ;;  %s1442_s5 = inlined_call_operand.hbm [shape: f32[4,64,256], index: 5, kind: output, shape index: {}]  }
   0x1   :  { %12 = vsyncpa [#allocation3 + $0x1], 0 }
   0x2   :  { %13 = vsyncpa [#allocation4], 0 }
   0x3   :  { %15 = vsyncpa [#allocation4 + $0x1], 0  ;;  %s1086_s18 = smov 0   ;;  %s1088_s19 = smov 0  }
   0x4   :  { %s1090_s20 = smov 0   ;;  %s1092_s21 = smov 0  }
   0x5 LB: > { %s1107_s22 = sadd.s32 4294967295, %s1044_s21   ;;  %s778_s23 = sadd.s32 4294967294, %s1044_s21   ;;  %s1044_s21 = sphi %s1092_s21, %s1456_s21   ;;  %s1040_s20 = sphi %s1090_s20, %s1455_s20   ;;  %s1036_s19 = sphi %s1088_s19, %s1454_s19   ;;  %s1032_s18 = sphi %s1086_s18, %s1453_s18  }
   0x6   : > { %s1111_s24 = sadd.s32 1, %s1044_s21   ;;  %s28_s25 = sadd.s32 1, %s1040_s20 }
   0x7   : > { %s25_s26 = ssub.s32 %s1044_s21, %s1111_s24  ;;  %p35_p0 = scmp.ne.s32.totalorder %s1040_s20, %s1036_s19 }
   0x8   : > { %p26_p1 = scmp.eq.s32.totalorder %s25_s26, 0  ;;  %p36_p2 = scmp.eq.s32.totalorder %s1044_s21, 0 }
   0x9   : > { %p41_p3 = scmp.ne.s32.totalorder %s1036_s19, %s1032_s18  ;;  %p42_p4 = scmp.eq.s32.totalorder %s1107_s22, 0 }
   0xa   : > { %s1123_s27 = scalar_select %p26_p1, %s1040_s20, %s28_s25  }
   0xb   : > { %p1125_p5 = por %p36_p2, %p35_p0  ;;  %p1129_p6 = por %p42_p4, %p41_p3 }
   0xc   : > { %p149_p7 = scmp.eq.s32.totalorder %s1107_s22, 3  ;;  %p155_p8 = scmp.eq.s32.totalorder %s778_s23, 3 }
   0xd   : > { %p898_p9 = scmp.lt.s32.totalorder %s1044_s21, 4  ;;  %s187_s7 = sand.u32 1, %s1040_s20  }
   0xe   : > { %p1135_p10 = por %p149_p7, %p35_p0  ;;  %p1139_p11 = por %p155_p8, %p41_p3 }
   0xf   : > { %s798_s8 = sshll.u32 %s1044_s21, 11  ;;  %s781_s9 = sshll.u32 %s187_s7, 7 }
  0x10   : > { %s1446_s30 = scalar_select %p1135_p10, 1, 0 }
  0x11   : > { %s1447_s6 = scalar_select %p1139_p11, 1, 0 }
  0x12   : > { %s1148_s12 = scalar_lea.hbm %s1437_s0, %s798_s8  ;;  %s191_s13 = scalar_lea.vmem [#allocation2], %s781_s9 }
  0x13   : > { %s198_s14 = sshll.u32 %s191_s13, 4  ;;  %p1152_p12 = pnand %p898_p9, %p1125_p5  ;;  %s1156_s14 = int_to_ptr.vmem [resolvable:$true] %s198_s14 }
  0x14   : > { %s1158_s16 = scalar_lea.sflag [#allocation3], %s187_s7  ;;  %s948_s17 = scalar_lea.hbm %s1148_s12, 2048 }
  0x15   : > { %p949_p13 = scmp.ne.s32.totalorder %s1148_s12, %s948_s17  ;;  %p950_p0 = pneg %p1152_p12 }
  0x16   : > { %s953_s26 = scalar_lea.hbm %s1437_s0, 8192  ;;  %p954_p3 = scmp.lt.u32.totalorder %s1148_s12, %s1437_s0 }
  0x17   : > { %p951_p1 = pnand %p950_p0, %p949_p13  ;;  %p955_p4 = scmp.lt.u32.totalorder %s953_s26, %s948_s17 }
  0x18   : > { %p957_p7 = scmp.lt.u32.totalorder %s948_s17, %s1148_s12 }
  0x19   : > { %p952_p2 = pneg %p951_p1  ;;  %p956_p5 = por %p955_p4, %p954_p3 }
  0x1b   : > { %p958_p8 = por %p957_p7, %p956_p5 }
  0x1d   : > { %p959_p9 = pnand %p958_p8, %p952_p2 }
  0x1f   : > { %962 = shalt.err (!%p959_p9)
}
  0x20   : > { %s963_s7 = scalar_lea.vmem %s1156_s14, 2048  ;;  %s1046_s9 = smov [#allocation2]  }
  0x21   : > { %p964_p13 = scmp.ne.s32.totalorder %s1156_s14, %s963_s7  ;;  %s968_s10 = sshll.u32 %s1046_s9, 4  ;;  %s969_s10 = int_to_ptr.vmem [resolvable:$false] %s968_s10 }
  0x22   : > { %s970_s11 = scalar_lea.vmem %s969_s10, 4096  ;;  %p971_p10 = scmp.lt.s32.totalorder %s1156_s14, %s969_s10 }
  0x23   : > { %p966_p1 = pnand %p964_p13, %p950_p0  ;;  %p972_p3 = scmp.lt.s32.totalorder %s970_s11, %s963_s7 }
  0x25   : > { %p967_p11 = pneg %p966_p1  ;;  %p973_p4 = por %p972_p3, %p971_p10 }
  0x27   : > { %p974_p5 = pnand %p973_p4, %p967_p11 }
  0x29   : > { %977 = shalt.err (!%p974_p5)
}
  0x2a   : > { %s1047_s13 = smov 256   ;;  %s1048_s17 = smov 16  }
  0x2b   : > { %893 = dma.hbm_to_vmem [thread:$0]  (!%p1152_p12), %s1148_s12, 2048, %s1156_s14, %s1158_s16, %s1047_s13, %s1047_s13, %s1048_s17  }
  0x2c   : > { %p784_p0 = scmp.ge.s32.totalorder %s1044_s21, 1  ;;  %p206_p2 = scmp.lt.s32.totalorder %s1044_s21, 5 }
  0x2e   : > { %p207_p7 = pnand %p784_p0, %p206_p2 }
  0x2f   : > { %s1189_s23 = sand.u32 (!%p207_p7), 1, %s1036_s19  }
  0x30   : > { %210 = sbr.rel (%p207_p7) target bundleno = 1355 (0x54b), region = 40  ;;  %s785_s25 = sshll.u32 (!%p207_p7), %s1189_s23, 7 }
  0x31   : > { %s213_s26 = scalar_lea.sflag (!%p207_p7), [#allocation3], %s1189_s23  ;;  %s216_s28 = scalar_lea.vmem (!%p207_p7), [#allocation2], %s785_s25 }
  0x37   : > { %1023 = dma.done.wait (%p1129_p6), %s213_s26, 2048  }
  0x38   : > { %1025 = vsyncadd (%p1129_p6), %s213_s26, 4294965248  ;;  %v1199_v0 = vld [vmem:[%s216_s28] sm:$0xff]  ;;  %v1201_v1 = vld [vmem:[%s216_s28 + $0x8] sm:$0xff]  ;;  %v1049_v27 = vmov 0.0|0.0   ;;  %vm1050_vm0 = vmmov 0   ;;  %v1051_v37 = vmov 0.0   ;;  %v308_v38 = vlaneseq }
  0x39   : > { %v1203_v2 = vld [vmem:[%s216_s28 + $0x20] sm:$0xff]  ;;  %v259_v3 = vadd.f32 %v1201_v1, %v1199_v0  ;;  %v1207_v4 = vld [vmem:[%s216_s28 + $0x28] sm:$0xff]  ;;  %v1209_v5 = vld [vmem:[%s216_s28 + $0x10] sm:$0xff]  ;;  %860 = vmatprep.subr.bf16.mxu0 %v1049_v27  ;;  %872 = vmatprep.subr.bf16.mxu1 %v1049_v27  ;;  %vm319_vm1 = vcmask 130112   ;;  %vm326_vm2 = vcmask 195712   ;;  %vm333_vm3 = vcmask 261312  }
  0x3a   : > { %v1211_v6 = vld [vmem:[%s216_s28 + $0x18] sm:$0xff]  ;;  %v265_v7 = vadd.f32 %v1207_v4, %v1203_v2  ;;  %v1215_v8 = vld [vmem:[%s216_s28 + $0x30] sm:$0xff]  ;;  %v1223_v12 = vld [vmem:[%s216_s28 + $0x40] sm:$0xff]  ;;  %835 = vmatprep.mubr.msk.f32.mxu0 %vm1050_vm0, %v1051_v37  ;;  %846 = vmatprep.mubr.msk.f32.mxu1 %vm1050_vm0, %v1051_v37  ;;  %v1280_v39 = vand.u32 127, %v308_v38  ;;  %v1282_v40 = vshrl.u32 %v308_v38, 7  ;;  %vm340_vm4 = vcmask 326912  }
  0x3b   : > { %v1217_v9 = vld [vmem:[%s216_s28 + $0x38] sm:$0xff]  ;;  %260 = vadd.xlane.f32.xlu0 %v259_v3  ;;  %v262_v10 = vadd.f32 %v1211_v6, %v1209_v5  ;;  %v1225_v13 = vld [vmem:[%s216_s28 + $0x48] sm:$0xff]  ;;  %v1227_v14 = vld [vmem:[%s216_s28 + $0x50] sm:$0xff]  ;;  %vm347_vm5 = vcmask 392512   ;;  %vm354_vm6 = vcmask 458112   ;;  %vm361_vm7 = vcmask 523712  }
  0x3c   : > { %266 = vadd.xlane.f32.xlu1 %v265_v7  ;;  %v268_v11 = vadd.f32 %v1217_v9, %v1215_v8  ;;  %v1229_v15 = vld [vmem:[%s216_s28 + $0x58] sm:$0xff]  ;;  %v271_v16 = vadd.f32 %v1225_v13, %v1223_v12  ;;  %v1235_v18 = vld [vmem:[%s216_s28 + $0x60] sm:$0xff]  ;;  %v1237_v19 = vld [vmem:[%s216_s28 + $0x68] sm:$0xff]  ;;  %v314_v41 = vadd.s32 4294967288, %v1280_v39  ;;  %v321_v43 = vadd.s32 4294967280, %v1280_v39  ;;  %s1357_s7 = scalar_lea.vmem [#allocation5], %s785_s25 }
  0x3d   : > { %v274_v17 = vadd.f32 %v1229_v15, %v1227_v14  ;;  %v1239_v20 = vld [vmem:[%s216_s28 + $0x70] sm:$0xff]  ;;  %v1241_v21 = vld [vmem:[%s216_s28 + $0x78] sm:$0xff]  ;;  %v277_v22 = vadd.f32 %v1237_v19, %v1235_v18  ;;  %v291_v24 = vld [vmem:[%s1438_s1] sm:$0xff]  ;;  %v328_v44 = vadd.s32 4294967272, %v1280_v39  ;;  %v312_v46 = vsub.s32 %v1280_v39, %v1282_v40  ;;  %s799_s25 = sshll.u32 %s1107_s22, 11  ;;  %s705_s9 = sshll.u32 %s1357_s7, 4  ;;  %s1390_s9 = int_to_ptr.vmem [resolvable:$true] %s705_s9 }
  0x3e   : > { %v280_v23 = vadd.f32 %v1241_v21, %v1239_v20  ;;  %v292_v25 = vld [vmem:[%s1438_s1 + $0x8] sm:$0xff]  ;;  %v293_v28 = vld [vmem:[%s1438_s1 + $0x10] sm:$0xff]  ;;  %v294_v29 = vld [vmem:[%s1438_s1 + $0x18] sm:$0xff]  ;;  %v317_v48 = vsub.s32 %v314_v41, %v1282_v40  ;;  %v335_v49 = vadd.s32 4294967264, %v1280_v39  ;;  %v324_v50 = vsub.s32 %v321_v43, %v1282_v40  ;;  %s1388_s13 = scalar_lea.hbm %s1442_s5, %s799_s25  ;;  %s692_s22 = scalar_lea.sflag [#allocation4], %s1189_s23 }
  0x3f   : > { %263 = vadd.xlane.f32.xlu0 %v262_v10  ;;  %v861_v26 = vpack.c.bf16 %v292_v25, %v291_v24  ;;  %v864_v30 = vpack.c.bf16 %v294_v29, %v293_v28  ;;  %v295_v31 = vld [vmem:[%s1438_s1 + $0x20] sm:$0xff]  ;;  %v296_v32 = vld [vmem:[%s1438_s1 + $0x28] sm:$0xff]  ;;  %v297_v34 = vld [vmem:[%s1438_s1 + $0x30] sm:$0xff]  ;;  %v331_v53 = vsub.s32 %v328_v44, %v1282_v40  ;;  %v342_v54 = vadd.s32 4294967256, %v1280_v39  ;;  %s978_s17 = scalar_lea.vmem %s1390_s9, 2048  ;;  %p1451_p10 = scmp.ne.s32.totalorder %s1446_s30, 0 }
  0x40   : > { %269 = vadd.xlane.f32.xlu1 %v268_v11  ;;  %v867_v33 = vpack.c.bf16 %v296_v32, %v295_v31  ;;  %v298_v35 = vld [vmem:[%s1438_s1 + $0x38] sm:$0xff]  ;;  %v338_v60 = vsub.s32 %v335_v49, %v1282_v40  ;;  %v349_v61 = vadd.s32 4294967248, %v1280_v39  ;;  %v356_v10 = vadd.s32 4294967240, %v1280_v39  ;;  %v299_v43 = vld [vmem:[%s1439_s2] sm:$0x1]  ;;  %p979_p6 = scmp.ne.s32.totalorder %s1390_s9, %s978_s17  ;;  %s1053_s26 = smov [#allocation5]  }
  0x41   : > { %862 = vmatpush3.bf16.msra.mxu0 %v861_v26  ;;  %v870_v36 = vpack.c.bf16 %v298_v35, %v297_v34  ;;  %v345_v7 = vsub.s32 %v342_v54, %v1282_v40  ;;  %vm363_vm8 = vcmask 523264   ;;  %vm436_vm9 = vcmp.lt.s32.totalorder %v1280_v39, 24  ;;  %s982_s28 = sshll.u32 %s1053_s26, 4  ;;  %s983_s28 = int_to_ptr.vmem [resolvable:$false] %s982_s28 }
  0x42   : > { %863 = vmatprep.subr.bf16.mxu0 %v1049_v27  ;;  %v352_v26 = vsub.s32 %v349_v61, %v1282_v40  ;;  %vm440_vm10 = vcmask 212992   ;;  %vm461_vm11 = vcmask 1042432   ;;  %vm1052_vm12 = vmmov 1   ;;  %p980_p11 = pnand %p979_p6, %p1451_p10  ;;  %s984_s29 = scalar_lea.vmem %s983_s28, 4096 }
  0x43   : > { %272 = vadd.xlane.f32.xlu0 %v271_v16  ;;  %vm1322_vm13 = vmpackc.low %vm461_vm11, %vm1052_vm12  ;;  %vm457_vm14 = vcmask 220160   ;;  %p985_p8 = scmp.lt.s32.totalorder %s1390_s9, %s983_s28  ;;  %p986_p9 = scmp.lt.s32.totalorder %s984_s29, %s978_s17 }
  0x44   : > { %275 = vadd.xlane.f32.xlu1 %v274_v17  ;;  %p981_p12 = pneg %p980_p11 }
  0x45   : > { %865 = vmatpush3.bf16.msra.mxu0 %v864_v30  ;;  %v359_v30 = vsub.s32 %v356_v10, %v1282_v40  ;;  %p987_p13 = por %p986_p9, %p985_p8 }
  0x46   : > { %866 = vmatprep.subr.bf16.mxu0 %v1049_v27 }
  0x47   : > { %278 = vadd.xlane.f32.xlu0 %v277_v22  ;;  %p988_p1 = pnand %p987_p13, %p981_p12 }
  0x48   : > { %281 = vadd.xlane.f32.xlu1 %v280_v23 }
  0x49   : > { %868 = vmatpush3.bf16.msra.mxu0 %v867_v33 }
  0x4a   : > { %869 = vmatprep.subr.bf16.mxu0 %v1049_v27 }
  0x4d   : > { %871 = vmatpush3.bf16.msra.mxu0 %v870_v36 }
  0xc8   : > { %v261_v42 = vpop.xlane.xlu0 %260 }
  0xc9   : > { %v267_v45 = vpop.xlane.xlu1 %266  ;;  %v283_v47 = vmul.f32 0.00390625, %v261_v42 }
  0xca   : > { %v285_v51 = vmul.f32 0.00390625, %v267_v45 }
  0xcb   : > { %v313_v58 = vrot.slane %v283_v47, %v312_v46 }
  0xcc   : > { %v264_v52 = vpop.xlane.xlu0 %263  ;;  %v325_v62 = vrot.slane %v285_v51, %v324_v50 }
  0xcd   : > { %v284_v55 = vmul.f32 0.00390625, %v264_v52  ;;  %v270_v56 = vpop.xlane.xlu1 %269 }
  0xce   : > { %v286_v57 = vmul.f32 0.00390625, %v270_v56  ;;  %v454_v56 = vld [vmem:[%s1440_s3 + $0x8] sm:$0xff] }
  0xcf   : > { %v318_v59 = vrot.slane %v284_v55, %v317_v48  ;;  %v453_v55 = vld [vmem:[%s1440_s3] sm:$0xff] }
  0xd0   : > { %v332_v63 = vrot.slane %v286_v57, %v331_v53  ;;  %v273_v3 = vpop.xlane.xlu0 %272  ;;  %v455_v57 = vld [vmem:[%s1440_s3 + $0x10] sm:$0xff] }
  0xd1   : > { %v320_v11 = vsel %vm319_vm1, %v318_v59, %v313_v58  ;;  %v287_v16 = vmul.f32 0.00390625, %v273_v3  ;;  %v276_v17 = vpop.xlane.xlu1 %275  ;;  %v873_v58 = vpack.c.bf16 %v454_v56, %v453_v55  ;;  %v456_v59 = vld [vmem:[%s1440_s3 + $0x18] sm:$0x7]  ;;  %v538_v3 = vld [vmem:[%s1441_s4 + $0x8] sm:$0xff] }
  0xd2   : > { %v327_v22 = vsel %vm326_vm2, %v325_v62, %v320_v11  ;;  %v288_v23 = vmul.f32 0.00390625, %v276_v17  ;;  %v540_v17 = vld [vmem:[%s1441_s4 + $0x18] sm:$0x7] }
  0xd3   : > { %v334_v24 = vsel %vm333_vm3, %v332_v63, %v327_v22  ;;  %v339_v25 = vrot.slane %v287_v16, %v338_v60  ;;  %874 = vmatpush3.bf16.msra.mxu1 %v873_v58  ;;  %v876_v60 = vpack.c.bf16 %v456_v59, %v455_v57  ;;  %v537_v63 = vld [vmem:[%s1441_s4] sm:$0xff]  ;;  %v539_v16 = vld [vmem:[%s1441_s4 + $0x10] sm:$0xff] }
  0xd4   : > { %v346_v28 = vrot.slane %v288_v23, %v345_v7  ;;  %v279_v29 = vpop.xlane.xlu0 %278  ;;  %875 = vmatprep.subr.bf16.mxu1 %v1049_v27  ;;  %v880_v10 = vpack.c.bf16 %v538_v3, %v537_v63  ;;  %v883_v22 = vpack.c.bf16 %v540_v17, %v539_v16 }
  0xd5   : > { %v341_v31 = vsel %vm340_vm4, %v339_v25, %v334_v24  ;;  %v289_v32 = vmul.f32 0.00390625, %v279_v29  ;;  %v282_v33 = vpop.xlane.xlu1 %281 }
  0xd6   : > { %v290_v34 = vmul.f32 0.00390625, %v282_v33  ;;  %v348_v36 = vsel %vm347_vm5, %v346_v28, %v341_v31  ;;  %v626_v33 = vsub.s32 0, %v1282_v40 }
  0xd7   : > { %v353_v35 = vrot.slane %v289_v32, %v352_v26  ;;  %878 = vmatpush3.bf16.msk.msra.mxu1 %vm1322_vm13, %v876_v60 }
  0xd8   : > { %v360_v38 = vrot.slane %v290_v34, %v359_v30  ;;  %879 = vmatprep.subr.bf16.mxu1 %v1049_v27 }
  0xd9   : > { %v355_v41 = vsel %vm354_vm6, %v353_v35, %v348_v36 }
  0xda   : > { %v362_v42 = vsel %vm361_vm7, %v360_v38, %v355_v41 }
  0xdb   : > { %836 = vmatmul.mubr.msk.f32.vlgmr.msra.gmra.mrb[0].mxu0 %vm363_vm8, %v362_v42 }
 0x1ae   : > { %v432_v44 = vpop.f32.mrb[0].mxu0 }
 0x1af   : > { %v433_v45 = vadd.f32 %v432_v44, %v299_v43  ;;  %v837_v46 = vpop.f32.mrb[1].mxu0 }
 0x1b1   : > { %v439_v47 = vsel %vm436_vm9, -inf, %v433_v45  ;;  %v437_v23 = vmax.f32 %v433_v45, 0.0 }
 0x1b2   : > { %v441_v48 = vsel %vm440_vm10, %v439_v47, -inf }
 0x1b3   : > { %442 = vmax.xlane.f32.xlu0 %v441_v48  ;;  %v438_v24 = vsel %vm436_vm9, %v437_v23, 0.0 }
 0x240   : > { %v443_v49 = vpop.xlane.xlu0 %442 }
 0x241   : > { %v444_v50 = vsub.f32 %v433_v45, %v443_v49 }
 0x243   : > { %v445_v51 = vmul.f32 1.442695, %v444_v50 }
 0x245   : > { %940 = vpow2.f32 %v445_v51 }
 0x24f   : > { %v941_v52 = vpop.eup %940 }
 0x250   : > { %v447_v53 = vsel %vm436_vm9, 0.0, %v941_v52 }
 0x251   : > { %v448_v54 = vsel %vm440_vm10, %v447_v53, 0.0 }
 0x252   : > { %449 = vadd.xlane.f32.xlu1 %v448_v54 }
 0x2df   : > { %v450_v62 = vpop.xlane.xlu1 %449 }
 0x2e0   : > { %942 = vrcp.f32 %v450_v62 }
 0x2ea   : > { %v943_v7 = vpop.eup %942 }
 0x2eb   : > { %v452_v11 = vmul.f32 %v943_v7, %v447_v53 }
 0x2ed   : > { %847 = vmatmul.mubr.msk.f32.vlgmr.msra.gmra.mrb[0].mxu1 %vm457_vm14, %v452_v11 }
 0x2ee   : > { %881 = vmatpush3.bf16.msra.mxu1 %v880_v10  ;;  %857 = vmatprep.mubr.msk.f32.mxu1 %vm1050_vm0, %v1051_v37 }
 0x2ef   : > { %882 = vmatprep.subr.bf16.mxu1 %v1049_v27 }
 0x2f2   : > { %885 = vmatpush3.bf16.msk.msra.mxu1 %vm1322_vm13, %v883_v22 }
 0x3c0   : > { %v531_v25 = vpop.f32.mrb[0].mxu1 }
 0x3c1   : > { %v535_v37 = vmul.f32 %v531_v25, %v438_v24  ;;  %v848_v26 = vpop.f32.mrb[1].mxu1 }
 0x3c3   : > { %v536_v27 = vadd.f32 %v535_v37, %v452_v11 }
 0x3c5   : > { %858 = vmatmul.mubr.msk.f32.vlgmr.msra.gmra.mrb[2].mxu1 %vm457_vm14, %v536_v27 }
 0x498   : > { %v613_v28 = vpop.f32.mrb[2].mxu1 }
 0x499   : > { %v792_v29 = vmul.f32 -1.442695, %v613_v28  ;;  %v859_v30 = vpop.f32.mrb[3].mxu1 }
 0x49b   : > { %944 = vpow2.f32 %v792_v29 }
 0x4a5   : > { %v945_v31 = vpop.eup %944 }
 0x4a6   : > { %v620_v32 = vadd.f32 1.0, %v945_v31 }
 0x4a8   : > { %946 = vrcp.f32 %v620_v32 }
 0x4b2   : > { %v947_v34 = vpop.eup %946 }
 0x4b3   : > { %v623_v35 = vadd.f32 1.0, %v947_v34 }
 0x4b5   : > { %v627_v39 = vrot.slane %v623_v35, %v626_v33 }
 0x4b7   : > { %633 = vbcast.lane.b32.xlu1 %v627_v39, 264  ;;  %629 = vbcast.lane.b32.xlu0 %v627_v39, 256 }
 0x4bb   : > { %637 = vbcast.lane.b32.xlu1 %v627_v39, 272  ;;  %645 = vbcast.lane.b32.xlu0 %v627_v39, 288 }
 0x4bf   : > { %641 = vbcast.lane.b32.xlu1 %v627_v39, 280  ;;  %653 = vbcast.lane.b32.xlu0 %v627_v39, 304 }
 0x4c3   : > { %649 = vbcast.lane.b32.xlu1 %v627_v39, 296 }
 0x4c7   : > { %657 = vbcast.lane.b32.xlu1 %v627_v39, 312 }
 0x529   : > { %v634_v36 = vpop.permute.xlu1 %633  ;;  %v630_v38 = vpop.permute.xlu0 %629 }
 0x52a   : > { %v661_v41 = vmul.f32 %v634_v36, %v1209_v5  ;;  %v662_v42 = vmul.f32 %v634_v36, %v1211_v6  ;;  %v659_v40 = vmul.f32 %v630_v38, %v1199_v0  ;;  %v660_v43 = vmul.f32 %v630_v38, %v1201_v1 }
 0x52c   : > { %677 = vst [vmem:[%s1357_s7 + $0x10] sm:$0xff] %v661_v41  ;;  %678 = vst [vmem:[%s1357_s7 + $0x18] sm:$0xff] %v662_v42 }
 0x52d   : > { %675 = vst [vmem:[%s1357_s7] sm:$0xff] %v659_v40  ;;  %676 = vst [vmem:[%s1357_s7 + $0x8] sm:$0xff] %v660_v43  ;;  %v638_v5 = vpop.permute.xlu1 %637  ;;  %v646_v0 = vpop.permute.xlu0 %645 }
 0x52e   : > { %v663_v1 = vmul.f32 %v638_v5, %v1203_v2  ;;  %v664_v6 = vmul.f32 %v638_v5, %v1207_v4  ;;  %v667_v44 = vmul.f32 %v646_v0, %v1223_v12  ;;  %v668_v45 = vmul.f32 %v646_v0, %v1225_v13 }
 0x530   : > { %679 = vst [vmem:[%s1357_s7 + $0x20] sm:$0xff] %v663_v1  ;;  %680 = vst [vmem:[%s1357_s7 + $0x28] sm:$0xff] %v664_v6 }
 0x531   : > { %683 = vst [vmem:[%s1357_s7 + $0x40] sm:$0xff] %v667_v44  ;;  %684 = vst [vmem:[%s1357_s7 + $0x48] sm:$0xff] %v668_v45  ;;  %v642_v46 = vpop.permute.xlu1 %641  ;;  %v654_v47 = vpop.permute.xlu0 %653 }
 0x532   : > { %v665_v2 = vmul.f32 %v642_v46, %v1215_v8  ;;  %v666_v48 = vmul.f32 %v642_v46, %v1217_v9  ;;  %v671_v4 = vmul.f32 %v654_v47, %v1235_v18  ;;  %v672_v12 = vmul.f32 %v654_v47, %v1237_v19 }
 0x534   : > { %681 = vst [vmem:[%s1357_s7 + $0x30] sm:$0xff] %v665_v2  ;;  %682 = vst [vmem:[%s1357_s7 + $0x38] sm:$0xff] %v666_v48 }
 0x535   : > { %687 = vst [vmem:[%s1357_s7 + $0x60] sm:$0xff] %v671_v4  ;;  %688 = vst [vmem:[%s1357_s7 + $0x68] sm:$0xff] %v672_v12  ;;  %v650_v13 = vpop.permute.xlu1 %649 }
 0x536   : > { %v669_v49 = vmul.f32 %v650_v13, %v1227_v14  ;;  %v670_v50 = vmul.f32 %v650_v13, %v1229_v15 }
 0x538   : > { %685 = vst [vmem:[%s1357_s7 + $0x50] sm:$0xff] %v669_v49  ;;  %686 = vst [vmem:[%s1357_s7 + $0x58] sm:$0xff] %v670_v50 }
 0x539   : > { %v658_v8 = vpop.permute.xlu1 %657 }
 0x53a   : > { %v673_v9 = vmul.f32 %v658_v8, %v1239_v20  ;;  %v674_v14 = vmul.f32 %v658_v8, %v1241_v21 }
 0x53c   : > { %689 = vst [vmem:[%s1357_s7 + $0x70] sm:$0xff] %v673_v9  ;;  %690 = vst [vmem:[%s1357_s7 + $0x78] sm:$0xff] %v674_v14 }
 0x53d   : > { %991 = shalt.err (!%p988_p1)
}
 0x53e   : > { %s992_s12 = scalar_lea.hbm %s1388_s13, 2048  ;;  %s996_s16 = scalar_lea.hbm %s1442_s5, 8192 }
 0x53f   : > { %p993_p3 = scmp.ne.s32.totalorder %s1388_s13, %s992_s12  ;;  %p997_p0 = scmp.lt.u32.totalorder %s1388_s13, %s1442_s5 }
 0x540   : > { %p998_p2 = scmp.lt.u32.totalorder %s996_s16, %s992_s12  ;;  %p1000_p6 = scmp.lt.u32.totalorder %s992_s12, %s1388_s13 }
 0x541   : > { %p994_p4 = pnand %p993_p3, %p1451_p10 }
 0x542   : > { %p999_p7 = por %p998_p2, %p997_p0 }
 0x543   : > { %p995_p5 = pneg %p994_p4 }
 0x544   : > { %p1001_p11 = por %p1000_p6, %p999_p7 }
 0x546   : > { %p1002_p12 = pnand %p1001_p11, %p995_p5 }
 0x548   : > { %1005 = shalt.err (!%p1002_p12)
}
 0x549   : > { %s1054_s25 = smov 256   ;;  %s1055_s10 = smov 16  }
 0x54a   : > { %888 = dma.vmem_to_hbm [thread:$0]  (%p1451_p10), %s1390_s9, 2048, %s1388_s13, %s692_s22, %s1054_s25, %s1054_s25, %s1055_s10  }
 0x54b PF: > { %p899_p8 = scmp.ge.s32.totalorder %s1044_s21, 2  ;;  %s720_s11 = sand.u32 1, %s1032_s18  }
 0x54c   : > { %p1452_p9 = scmp.ne.s32.totalorder %s1447_s6, 0  ;;  %s721_s17 = scalar_lea.sflag [#allocation4], %s720_s11 }
 0x54e   : > { %p895_p13 = pnand %p899_p8, %p1452_p9 }
 0x550   : > { %1027 = dma.done.wait (!%p895_p13), %s721_s17, 2048  }
 0x551   : > { %1029 = vsyncadd (!%p895_p13), %s721_s17, 4294965248  ;;  %p18_p1 = scmp.ge.s32.totalorder %s1111_s24, 6   ;;  %s1453_s18 = smov %s1036_s19 }
 0x552   : > { %s1454_s19 = smov %s1040_s20  ;;  %s1455_s20 = smov %s1123_s27 }
 0x553   : > { %s1456_s21 = smov %s1111_s24  ;;  %20 = sbr.rel (!%p18_p1) target bundleno = 5 (0x5), region = 85 }
 0x55a   :  { %726 = vsyncpa [#allocation3], 1 }
 0x55b   :  { %728 = vsyncpa [#allocation3 + $0x1], 1 }
 0x55c   :  { %729 = vsyncpa [#allocation4], 1 }
 0x55d   :  { %731 = vsyncpa [#allocation4 + $0x1], 1 }

</bundles_post_ra>
